<compile_context>
chip_gen: v6e
topology: v6e:2x2x1
jax: 0.10.0
libtpu: 0.0.40
codegen_flags: <defaults>
</compile_context>

<pallas_src>
import jax
import jax.numpy as jnp
from jax.experimental import pallas as pl
from jax.experimental.pallas import tpu as pltpu

IN_FEATURES = 10
HIDDEN = 16
OUT_FEATURES = 2


def mlp_kernel(x_ref, w1_ref, b1_ref, w2_ref, b2_ref, o_ref):
    # One grid step = one (10, TB) batch tile (batch on lanes). Weights/biases
    # are VMEM-resident across all steps (index_map always returns block (0,0)).
    x_t = x_ref[...]                                          # (10, TB) f32

    # Layer 1: W1 (16,10) @ x_T (10,TB) -> h_T (16,TB). PyTorch (out,in) layout
    # contracts directly; no transpose anywhere.
    h_t = jnp.dot(w1_ref[...], x_t, preferred_element_type=jnp.float32)
    h_t = jnp.maximum(h_t + b1_ref[...], 0.0)                 # bias column + ReLU

    # Layer 2: W2 (2,16) @ h_T (16,TB) -> y_T (2,TB)
    y_t = jnp.dot(w2_ref[...], h_t, preferred_element_type=jnp.float32)
    o_ref[...] = (y_t + b2_ref[...]).astype(o_ref.dtype)


def neural_net_forward(x, w1, b1, w2, b2, *, max_block_cols=8192):
    """Forward pass of NeuralNet.

    x:  (B, 10) f32
    w1: (16, 10), b1: (16,)   -- PyTorch nn.Linear layouts
    w2: (2, 16),  b2: (2,)
    returns (B, 2) f32
    """
    B, F = x.shape
    assert F == IN_FEATURES

    # Lane-dense layout: batch on the last (lane) axis.
    x_t = x.T                                   # (10, B)

    # Batch tile (lane axis). Block last dim must be a multiple of 128 or equal
    # the full array dim; the partial trailing tile (B % TB != 0) is masked by
    # Pallas, so no padding / slicing round trip is needed.
    if B <= 128:
        TB = B
    else:
        TB = min(max_block_cols, ((B + 127) // 128) * 128)
    grid = (pl.cdiv(B, TB),)

    # Biases as columns so they broadcast over the lane (batch) axis.
    b1_c = b1.reshape(HIDDEN, 1)
    b2_c = b2.reshape(OUT_FEATURES, 1)

    cost = pl.CostEstimate(
        flops=2 * B * (IN_FEATURES * HIDDEN + HIDDEN * OUT_FEATURES),
        transcendentals=0,
        bytes_accessed=4 * (B * (IN_FEATURES + OUT_FEATURES)
                            + HIDDEN * IN_FEATURES + HIDDEN
                            + OUT_FEATURES * HIDDEN + OUT_FEATURES),
    )

    out_t = pl.pallas_call(
        mlp_kernel,
        out_shape=jax.ShapeDtypeStruct((OUT_FEATURES, B), jnp.float32),
        grid=grid,
        in_specs=[
            # x_T streamed per batch tile (lane-dense)
            pl.BlockSpec((IN_FEATURES, TB), lambda i: (0, i)),
            # weights / biases resident in VMEM across all grid steps
            pl.BlockSpec((HIDDEN, IN_FEATURES), lambda i: (0, 0)),
            pl.BlockSpec((HIDDEN, 1), lambda i: (0, 0)),
            pl.BlockSpec((OUT_FEATURES, HIDDEN), lambda i: (0, 0)),
            pl.BlockSpec((OUT_FEATURES, 1), lambda i: (0, 0)),
        ],
        out_specs=pl.BlockSpec((OUT_FEATURES, TB), lambda i: (0, i)),
        compiler_params=pltpu.CompilerParams(
            dimension_semantics=("parallel",),  # shard batch tiles across TCs (v7x)
        ),
        cost_estimate=cost,
    )(x_t, w1, b1_c, w2, b2_c)

    return out_t.T                              # (B, 2)


def init_params(key):
    """Deterministic init mimicking nn.Linear's uniform(-1/sqrt(fan_in), ...)."""
    k1, k2, k3, k4 = jax.random.split(key, 4)
    bound1 = 1.0 / jnp.sqrt(float(IN_FEATURES))
    bound2 = 1.0 / jnp.sqrt(float(HIDDEN))
    w1 = jax.random.uniform(k1, (HIDDEN, IN_FEATURES), jnp.float32, -bound1, bound1)
    b1 = jax.random.uniform(k2, (HIDDEN,), jnp.float32, -bound1, bound1)
    w2 = jax.random.uniform(k3, (OUT_FEATURES, HIDDEN), jnp.float32, -bound2, bound2)
    b2 = jax.random.uniform(k4, (OUT_FEATURES,), jnp.float32, -bound2, bound2)
    return w1, b1, w2, b2


if __name__ == "__main__":
    key = jax.random.PRNGKey(0)
    kx, kp = jax.random.split(key)
    w1, b1, w2, b2 = init_params(kp)

    def ref_fwd(xx):
        return jnp.maximum(xx @ w1.T + b1, 0.0) @ w2.T + b2

    # Small-batch case (block == full array dims).
    B = 8
    x = jax.random.normal(kx, (B, IN_FEATURES), dtype=jnp.float32)
    out = jax.block_until_ready(neural_net_forward(x, w1, b1, w2, b2))
    assert out.shape == (B, OUT_FEATURES)
    assert jnp.allclose(out, ref_fwd(x), atol=1e-5, rtol=1e-5)

    # Multi-tile case with a masked partial trailing block (no pad/slice path).
    B2 = 200
    x2 = jax.random.normal(jax.random.PRNGKey(1), (B2, IN_FEATURES), dtype=jnp.float32)
    out2 = jax.block_until_ready(
        neural_net_forward(x2, w1, b1, w2, b2, max_block_cols=128))
    assert out2.shape == (B2, OUT_FEATURES)
    assert jnp.allclose(out2, ref_fwd(x2), atol=1e-5, rtol=1e-5)

    print("KERNEL_OK")
</pallas_src>

<mosaic_0001>
module attributes {stable_mosaic.version = 11 : i64} {
  func.func @mlp_kernel(%arg0: i32, %arg1: memref<10x8xf32, #tpu.memory_space<vmem>>, %arg2: memref<16x10xf32, #tpu.memory_space<vmem>>, %arg3: memref<16x1xf32, #tpu.memory_space<vmem>>, %arg4: memref<2x16xf32, #tpu.memory_space<vmem>>, %arg5: memref<2x1xf32, #tpu.memory_space<vmem>>, %arg6: memref<2x8xf32, #tpu.memory_space<vmem>>) attributes {dimension_semantics = [#tpu.dimension_semantics<parallel>], iteration_bounds = array<i64: 1>, scalar_prefetch = 0 : i64, scratch_operands = 0 : i64, tpu.core_type = #tpu.core_type<tc>, window_params = [{transform_indices = @transform_0, window_bounds = array<i64: 10, 8>}, {pipeline_mode = #tpu.pipeline_mode<synchronous>, transform_indices = @transform_1, window_bounds = array<i64: 16, 10>}, {pipeline_mode = #tpu.pipeline_mode<synchronous>, transform_indices = @transform_2, window_bounds = array<i64: 16, 1>}, {pipeline_mode = #tpu.pipeline_mode<synchronous>, transform_indices = @transform_3, window_bounds = array<i64: 2, 16>}, {pipeline_mode = #tpu.pipeline_mode<synchronous>, transform_indices = @transform_4, window_bounds = array<i64: 2, 1>}, {transform_indices = @transform_5, window_bounds = array<i64: 2, 8>}]} {
    %c0 = arith.constant 0 : index
    %c0_0 = arith.constant 0 : index
    %0 = vector.load %arg1[%c0, %c0_0] : memref<10x8xf32, #tpu.memory_space<vmem>>, vector<10x8xf32>
    %c0_1 = arith.constant 0 : index
    %c0_2 = arith.constant 0 : index
    %1 = vector.load %arg2[%c0_1, %c0_2] : memref<16x10xf32, #tpu.memory_space<vmem>>, vector<16x10xf32>
    %cst = arith.constant dense<0.000000e+00> : vector<16x8xf32>
    %2 = tpu.matmul %1, %0, %cst {dimension_numbers = #tpu.dot_dimension_numbers<[1], [0], [0], [1], [0, 0, 1, 1], [], []>} : vector<16x10xf32>, vector<10x8xf32>, vector<16x8xf32> -> vector<16x8xf32>
    %c0_3 = arith.constant 0 : index
    %c0_4 = arith.constant 0 : index
    %3 = vector.load %arg3[%c0_3, %c0_4] : memref<16x1xf32, #tpu.memory_space<vmem>>, vector<16x1xf32>
    %4 = vector.broadcast %3 : vector<16x1xf32> to vector<16x8xf32>
    %5 = arith.addf %2, %4 : vector<16x8xf32>
    %cst_5 = arith.constant 0.000000e+00 : f32
    %6 = vector.broadcast %cst_5 : f32 to vector<16x8xf32>
    %7 = arith.maximumf %5, %6 : vector<16x8xf32>
    %c0_6 = arith.constant 0 : index
    %c0_7 = arith.constant 0 : index
    %8 = vector.load %arg4[%c0_6, %c0_7] : memref<2x16xf32, #tpu.memory_space<vmem>>, vector<2x16xf32>
    %cst_8 = arith.constant dense<0.000000e+00> : vector<2x8xf32>
    %9 = tpu.matmul %8, %7, %cst_8 {dimension_numbers = #tpu.dot_dimension_numbers<[1], [0], [0], [1], [0, 0, 1, 1], [], []>} : vector<2x16xf32>, vector<16x8xf32>, vector<2x8xf32> -> vector<2x8xf32>
    %c0_9 = arith.constant 0 : index
    %c0_10 = arith.constant 0 : index
    %10 = vector.load %arg5[%c0_9, %c0_10] : memref<2x1xf32, #tpu.memory_space<vmem>>, vector<2x1xf32>
    %11 = vector.broadcast %10 : vector<2x1xf32> to vector<2x8xf32>
    %12 = arith.addf %9, %11 : vector<2x8xf32>
    %c0_11 = arith.constant 0 : index
    %c0_12 = arith.constant 0 : index
    %13 = vector.load %arg6[%c0_11, %c0_12] : memref<2x8xf32, #tpu.memory_space<vmem>>, vector<2x8xf32>
    tpu.vector_store %arg6[%c0_11, %c0_12], %12 {strides = array<i32>} : memref<2x8xf32, #tpu.memory_space<vmem>>, vector<2x8xf32>,
    return
  }
  func.func @transform_0(%arg0: i32) -> (i32, i32) {
    %c0_i32 = arith.constant 0 : i32
    %c0_i32_0 = arith.constant 0 : i32
    return %c0_i32, %arg0 : i32, i32
  }
  func.func @transform_1(%arg0: i32) -> (i32, i32) {
    %c0_i32 = arith.constant 0 : i32
    %c0_i32_0 = arith.constant 0 : i32
    %c0_i32_1 = arith.constant 0 : i32
    return %c0_i32, %c0_i32_0 : i32, i32
  }
  func.func @transform_2(%arg0: i32) -> (i32, i32) {
    %c0_i32 = arith.constant 0 : i32
    %c0_i32_0 = arith.constant 0 : i32
    %c0_i32_1 = arith.constant 0 : i32
    return %c0_i32, %c0_i32_0 : i32, i32
  }
  func.func @transform_3(%arg0: i32) -> (i32, i32) {
    %c0_i32 = arith.constant 0 : i32
    %c0_i32_0 = arith.constant 0 : i32
    %c0_i32_1 = arith.constant 0 : i32
    return %c0_i32, %c0_i32_0 : i32, i32
  }
  func.func @transform_4(%arg0: i32) -> (i32, i32) {
    %c0_i32 = arith.constant 0 : i32
    %c0_i32_0 = arith.constant 0 : i32
    %c0_i32_1 = arith.constant 0 : i32
    return %c0_i32, %c0_i32_0 : i32, i32
  }
  func.func @transform_5(%arg0: i32) -> (i32, i32) {
    %c0_i32 = arith.constant 0 : i32
    %c0_i32_0 = arith.constant 0 : i32
    return %c0_i32, %arg0 : i32, i32
  }
}

</mosaic_0001>

<bundles_post_ra>
// kernel: tpu_custom_call.1
= control target key start
LH: loop header
LB: loop body
LE: loop exit
PB: predicated region body
PF: predicated region fallthrough
CT: control target
= control target key end

     0   :  { %vm44_vm0 = vcmask 1041408   ;;  %vm37_vm1 = vcmask 80896   ;;  %v275_v5 = vmov 0   ;;  %s336_s0 = inlined_call_operand.vmem [shape: f32[10,8], index: 0, kind: input, shape index: {}]   ;;  %s337_s1 = inlined_call_operand.vmem [shape: f32[16,10], index: 1, kind: input, shape index: {}]   ;;  %s338_s2 = inlined_call_operand.vmem [shape: f32[16,1], index: 2, kind: input, shape index: {}]   ;;  %s339_s3 = inlined_call_operand.vmem [shape: f32[2,16], index: 3, kind: input, shape index: {}]   ;;  %s340_s4 = inlined_call_operand.vmem [shape: f32[2,1], index: 4, kind: input, shape index: {}]   ;;  %s341_s5 = inlined_call_operand.hbm [shape: f32[2,8], index: 5, kind: output, shape index: {}]  }
   0x1   :  { %v22_v0 = vld [vmem:[%s336_s0 + $0x8] sm:$0x3]  ;;  %v21_v1 = vld [vmem:[%s336_s0] sm:$0xff]  ;;  %251 = vset.pattern.permute.xlu0 %v275_v5 }
   0x2   :  { %v23_v2 = vld [vmem:[%s337_s1] sm:$0xff]  ;;  %233 = vmatprep.subr.msk.mxu0 %vm44_vm0, %v22_v0  ;;  %v26_v3 = vld [vmem:[%s338_s2 + $0x8] sm:$0xff] }
   0x3   :  { %237 = vmatprep.mubr.msk.f32.mxu0 %vm37_vm1, %v23_v2  ;;  %234 = vmatpush3.msk.msra.mxu0 %vm44_vm0, %v22_v0  ;;  %v24_v4 = vld [vmem:[%s337_s1 + $0x8] sm:$0xff] }
   0x4   :  { %10 = vsyncpa [#allocation3], 0  ;;  %235 = vmatprep.subr.mxu0 %v21_v1  ;;  %34 = vperm.xlu0 %251, %v26_v3   ;;  %v25_v6 = vld [vmem:[%s338_s2] sm:$0xff]  ;;  %v276_v7 = vmov 0.0   ;;  %vm277_vm2 = vmmov 0   ;;  %vm132_vm3 = vcmask 130048  }
   0x5   :  { %236 = vmatpush3.msra.mxu0 %v21_v1  ;;  %252 = vset.pattern.permute.xlu1 %v275_v5  ;;  %v126_v8 = vld [vmem:[%s340_s4] sm:$0x3]  ;;  %s278_s4 = smov [#allocation2]   ;;  %vm206_vm4 = vcmask 58368  }
   0x6   :  { %238 = vmatmul.mubr.msk.f32.vlgmr.msra.gmra.mxu0 %vm37_vm1, %v24_v4  ;;  %240 = vmatprep.subr.mxu1 %v276_v7  ;;  %v125_v17 = vld [vmem:[%s339_s3] sm:$0x3]  ;;  %s214_s6 = sshll.u32 %s278_s4, 4  ;;  %s215_s6 = int_to_ptr.vmem [resolvable:$true] %s214_s6 }
   0x7   :  { %244 = vmatprep.mubr.msk.f32.mxu1 %vm277_vm2, %v276_v7  ;;  %129 = vperm.xlu1 %252, %v126_v8   ;;  %s253_s7 = scalar_lea.vmem %s215_s6, 32  ;;  %p258_p1 = scmp.lt.s32.totalorder %s215_s6, %s215_s6 }
   0x8   :  { %29 = vperm.xlu0 %251, %v25_v6   ;;  %p254_p0 = scmp.ne.s32.totalorder %s215_s6, %s253_s7  ;;  %p259_p2 = scmp.lt.s32.totalorder %s253_s7, %s253_s7 }
   0xa   :  { %p260_p3 = por %p259_p2, %p258_p1 }
   0xc   :  { %p261_p4 = pnand %p260_p3, %p254_p0 }
  0x7f   :  { %v35_v9 = vpop.permute.xlu0 %34 }
  0x82   :  { %v130_v18 = vpop.permute.xlu1 %129 }
  0x83   :  { %v30_v12 = vpop.permute.xlu0 %29 }
  0xc6   :  { %v239_v10 = vpop.f32.mrf.mxu0 }
  0xc7   :  { %v120_v11 = vadd.f32 %v239_v10, %v35_v9 }
  0xc8   :  { %v114_v13 = vpop.f32.mrf.mxu0 }
  0xc9   :  { %v124_v14 = vmax.f32 %v120_v11, 0.0  ;;  %v115_v15 = vadd.f32 %v114_v13, %v30_v12 }
  0xcb   :  { %v123_v16 = vmax.f32 %v115_v15, 0.0  ;;  %241 = vmatpush3.msra.mxu1 %v124_v14 }
  0xcc   :  { %242 = vmatprep.subr.mxu1 %v276_v7 }
  0xcd   :  { %243 = vmatpush3.msra.mxu1 %v123_v16 }
  0xce   :  { %245 = vmatmul.mubr.msk.f32.vlgmr.msra.gmra.mxu1 %vm132_vm3, %v125_v17 }
 0x18e   :  { %v202_v19 = vpop.f32.mrf.mxu1 }
 0x18f   :  { %v203_v20 = vadd.f32 %v202_v19, %v130_v18 }
 0x190   :  { %v246_v21 = vpop.f32.mrf.mxu1 }
 0x191   :  { %207 = vst.msk [vmem:[#allocation2] sm:$0x3] %vm206_vm4, %v203_v20 }
 0x192   :  { %264 = shalt.err (!%p261_p4)
}
 0x193   :  { %217 = dma.vmem_to_hbm [thread:$0]  %s215_s6, 32, %s341_s5, [#allocation3]  }
 0x194   :  { %273 = dma.done.wait [#allocation3], 32  }
 0x195   :  { %274 = vsyncadd [#allocation3], 4294967264 }
 0x196   :  { %221 = vsyncpa [#allocation3], 1 }

</bundles_post_ra>
